<compile_context>
chip_gen: v7x
topology: tpu7x:2x2x1
jax: 0.10.0
libtpu: 0.0.40
codegen_flags: <defaults>
</compile_context>

<pallas_src>
import functools

import jax
import jax.numpy as jnp
from jax.experimental import pallas as pl
from jax.experimental.pallas import tpu as pltpu


def _round_up(v: int, m: int) -> int:
    return (v + m - 1) // m * m


def _vmem_cap_bytes() -> int:
    """Physical VMEM per core; conservative v7x-sized fallback if unqueryable."""
    try:
        return int(pltpu.get_tpu_info().vmem_capacity_bytes)
    except Exception:
        return 64 * 1024 * 1024


# ---------------------------------------------------------------------------
# Kernels
# ---------------------------------------------------------------------------

def _fused_gresblock_kernel(adj_ref, xw1_ref, b1_ref, w2_ref, b2_ref, x_ref, o_ref):
    """Both GCN layers + residual with adj resident in VMEM (read once)."""
    adj = adj_ref[...]
    # Layer 1: h1 = adj @ (x @ W1) + b1   (x @ W1 hoisted to the wrapper)
    h1 = jnp.dot(adj, xw1_ref[...], preferred_element_type=jnp.float32)
    h1 = h1 + b1_ref[...].astype(jnp.float32)
    # Layer 2: h2 = adj @ (h1 @ W2) + b2
    h1w2 = jnp.dot(h1.astype(w2_ref.dtype), w2_ref[...],
                   preferred_element_type=jnp.float32)
    h2 = jnp.dot(adj, h1w2.astype(adj.dtype), preferred_element_type=jnp.float32)
    h2 = h2 + b2_ref[...].astype(jnp.float32)
    # Residual epilogue in f32, single cast at the store.
    o_ref[...] = ((x_ref[...].astype(jnp.float32) + h2) * 0.5).astype(o_ref.dtype)


def _spmm_bias_kernel(adj_ref, fw_ref, b_ref, o_ref):
    """Row tile of one GCN layer with the weight matmul hoisted:
       o = adj_tile @ featW + b."""
    h = jnp.dot(adj_ref[...], fw_ref[...], preferred_element_type=jnp.float32)
    o_ref[...] = (h + b_ref[...].astype(jnp.float32)).astype(o_ref.dtype)


def _spmm_bias_residual_kernel(adj_ref, fw_ref, b_ref, x_ref, o_ref):
    """Second layer row tile with fused residual:
       o = (x + adj_tile @ featW + b) * 0.5."""
    h = jnp.dot(adj_ref[...], fw_ref[...], preferred_element_type=jnp.float32)
    h = h + b_ref[...].astype(jnp.float32)
    o_ref[...] = ((x_ref[...].astype(jnp.float32) + h) * 0.5).astype(o_ref.dtype)


# ---------------------------------------------------------------------------
# pallas_call wrappers
# ---------------------------------------------------------------------------

def _fused_call(adj_c, xw1_c, b1, w2_c, b2, x, vmem_limit):
    N, D = x.shape
    cb = jnp.dtype(adj_c.dtype).itemsize
    xb = jnp.dtype(x.dtype).itemsize

    def full2(shape):
        return pl.BlockSpec(shape, lambda i: (0, 0))

    flops = 2 * (2 * N * N * D) + 2 * N * D * D
    bytes_accessed = (N * N * cb + N * D * cb + D * D * cb + 2 * D * 4
                      + 2 * N * D * xb)

    return pl.pallas_call(
        _fused_gresblock_kernel,
        out_shape=jax.ShapeDtypeStruct((N, D), x.dtype),
        grid=(1,),
        in_specs=[full2((N, N)), full2((N, D)), full2((1, D)),
                  full2((D, D)), full2((1, D)), full2((N, D))],
        out_specs=full2((N, D)),
        compiler_params=pltpu.CompilerParams(
            dimension_semantics=("arbitrary",),
            vmem_limit_bytes=vmem_limit,
        ),
        cost_estimate=pl.CostEstimate(
            flops=int(flops), transcendentals=0, bytes_accessed=int(bytes_accessed)),
    )(adj_c, xw1_c, b1, w2_c, b2, x)


def _streamed_layer(adj_c, fw_c, b, xres, tm, out_dtype, vmem_limit):
    """Row-tiled adj streaming (double-buffered) for one hoisted-weight layer."""
    Np, _ = adj_c.shape
    _, D = fw_c.shape
    n_tiles = Np // tm
    cb = jnp.dtype(adj_c.dtype).itemsize

    adj_spec = pl.BlockSpec((tm, Np), lambda i: (i, 0))      # streamed
    fw_spec = pl.BlockSpec((Np, D), lambda i: (0, 0))        # VMEM-resident
    b_spec = pl.BlockSpec((1, D), lambda i: (0, 0))          # VMEM-resident
    out_spec = pl.BlockSpec((tm, D), lambda i: (i, 0))       # streamed

    flops = 2 * Np * Np * D
    bytes_accessed = (Np * Np * cb + Np * D * cb + D * 4
                      + Np * D * jnp.dtype(out_dtype).itemsize)

    if xres is None:
        kernel = _spmm_bias_kernel
        operands = (adj_c, fw_c, b)
        in_specs = [adj_spec, fw_spec, b_spec]
    else:
        kernel = _spmm_bias_residual_kernel
        operands = (adj_c, fw_c, b, xres)
        in_specs = [adj_spec, fw_spec, b_spec,
                    pl.BlockSpec((tm, D), lambda i: (i, 0))]
        bytes_accessed += Np * D * jnp.dtype(xres.dtype).itemsize

    return pl.pallas_call(
        kernel,
        out_shape=jax.ShapeDtypeStruct((Np, D), out_dtype),
        grid=(n_tiles,),
        in_specs=in_specs,
        out_specs=out_spec,
        compiler_params=pltpu.CompilerParams(
            dimension_semantics=("parallel",),
            vmem_limit_bytes=vmem_limit,
        ),
        cost_estimate=pl.CostEstimate(
            flops=int(flops), transcendentals=0, bytes_accessed=int(bytes_accessed)),
    )(*operands)


# ---------------------------------------------------------------------------
# Public entry point
# ---------------------------------------------------------------------------

@functools.partial(jax.jit,
                   static_argnames=("compute_dtype", "force_streaming", "tm_target"))
def gresblock(x, adj, w1, b1, w2, b2, *, compute_dtype=jnp.bfloat16,
              force_streaming=False, tm_target=512):
    """x: [N, D], adj: [N, N], w*: [D, D], b*: [D] or [1, D] -> [N, D]."""
    N, D = x.shape
    assert adj.shape == (N, N), "adj must be [N, N]"
    assert w1.shape == (D, D) and w2.shape == (D, D), (
        "residual (input + x) * 0.5 requires in_dim == hidden_dim")

    cd = jnp.dtype(compute_dtype)
    cb = cd.itemsize
    xb = jnp.dtype(x.dtype).itemsize
    b1 = b1.reshape(1, D).astype(jnp.float32)
    b2 = b2.reshape(1, D).astype(jnp.float32)

    cap = _vmem_cap_bytes()
    vmem_limit = int(cap * 0.85)   # ~54 MiB on v7x (64 MiB/TC), ~109 MiB on v5e/v6e

    # Hoisted weight matmuls (once, at full precision) + adjacency cast.
    xw1 = jnp.dot(x, w1, preferred_element_type=jnp.float32).astype(cd)
    adj_c = adj.astype(cd)
    w2_c = w2.astype(cd)

    # ---- Fused read-once path: adj resident in VMEM, no padding needed. ----
    nr = _round_up(N, 16 if cb == 2 else 8)
    nc = _round_up(N, 128)
    dr = _round_up(D, 128)
    fused_need = (nr * nc * cb                       # resident adj
                  + 2 * nr * dr * cb                 # xw1 (x2: possible dbl-buf)
                  + 2 * nr * dr * xb                 # residual x
                  + 2 * nr * dr * xb                 # output
                  + 2 * dr * dr * cb + 4 * dr * 4    # w2, biases
                  + 4 * nr * dr * 4)                 # f32 intermediates
    use_fused = (not force_streaming) and fused_need <= int(vmem_limit * 0.7)

    if use_fused:
        return _fused_call(adj_c, xw1, b1, w2_c, b2, x, vmem_limit)

    # ---- Streaming path (large N): row-tiled adj, double-buffered. ----------
    # Row tile from the VMEM budget; split N into equal 8-aligned tiles so the
    # pad overhead is < 8 rows per tile (no rounding N up to a multiple of tm).
    budget = int(vmem_limit * 0.8)
    resident = 2 * _round_up(N, 8) * _round_up(D, 128) * cb + 4 * _round_up(D, 128) * 4
    per_row = 2 * _round_up(N, 128) * cb + 2 * D * cb + 4 * D * xb + D * 4
    tm_cap = max(8, (budget - resident) // max(per_row, 1))
    tm_max = max(8, min(int(tm_target), int(tm_cap), _round_up(N, 8)))
    n_tiles = pl.cdiv(N, tm_max)
    tm = _round_up(pl.cdiv(N, n_tiles), 8)
    np_ = n_tiles * tm
    pad_n = np_ - N

    # Zero padding is exact: padded adj columns are zero, so garbage in padded
    # h1 rows never leaks into the valid [:N] rows returned below.
    adj_p = jnp.pad(adj_c, ((0, pad_n), (0, pad_n))) if pad_n else adj_c
    xw1_p = jnp.pad(xw1, ((0, pad_n), (0, 0))) if pad_n else xw1
    x_p = jnp.pad(x, ((0, pad_n), (0, 0))) if pad_n else x

    # Layer 1: h1 = adj @ (x @ W1) + b1
    h1 = _streamed_layer(adj_p, xw1_p, b1, None, tm, cd, vmem_limit)
    # Hoisted second weight matmul (single wrapper-level matmul).
    h1w2 = jnp.dot(h1, w2_c, preferred_element_type=jnp.float32).astype(cd)
    # Layer 2 + fused residual: out = (x + adj @ (h1 @ W2) + b2) * 0.5
    out_p = _streamed_layer(adj_p, h1w2, b2, x_p, tm, x.dtype, vmem_limit)
    return out_p[:N] if pad_n else out_p


def gresblock_ref(x, adj, w1, b1, w2, b2):
    h1 = adj @ (x @ w1) + b1.reshape(1, -1)
    h2 = adj @ (h1 @ w2) + b2.reshape(1, -1)
    return (x + h2) * 0.5


if __name__ == "__main__":
    N = 16      # number of graph nodes
    D = 32      # in_dim == hidden_dim (required by the residual connection)

    key = jax.random.PRNGKey(0)
    kx, kw1, kb1, kw2, kb2 = jax.random.split(key, 5)

    x = jax.random.normal(kx, (N, D), dtype=jnp.float32)

    # Deterministic row-normalized adjacency: ring graph + self loops.
    idx = jnp.arange(N)
    a = jnp.zeros((N, N), dtype=jnp.float32)
    a = a.at[idx, idx].set(1.0)
    a = a.at[idx, (idx + 1) % N].set(1.0)
    a = a.at[idx, (idx - 1) % N].set(1.0)
    adj = a / a.sum(axis=1, keepdims=True)

    # Deterministic "glorot-ish" parameter init (synthetic, not a checkpoint).
    scale = 1.0 / jnp.sqrt(jnp.float32(D))
    w1 = jax.random.uniform(kw1, (D, D), jnp.float32, -scale, scale)
    b1 = jax.random.uniform(kb1, (1, D), jnp.float32, -scale, scale)
    w2 = jax.random.uniform(kw2, (D, D), jnp.float32, -scale, scale)
    b2 = jax.random.uniform(kb2, (1, D), jnp.float32, -scale, scale)

    ref = gresblock_ref(x, adj, w1, b1, w2, b2)

    # 1) Fused read-once path, f32 compute: tight check vs. f32 reference.
    out_f32 = jax.block_until_ready(
        gresblock(x, adj, w1, b1, w2, b2, compute_dtype=jnp.float32))
    assert out_f32.shape == (N, D)
    assert jnp.allclose(out_f32, ref, atol=1e-4, rtol=1e-4), "f32 path mismatch"

    # 2) Fused path with bf16 adjacency/operands (bandwidth-optimized default).
    out_bf = jax.block_until_ready(gresblock(x, adj, w1, b1, w2, b2))
    assert out_bf.shape == (N, D)
    assert jnp.allclose(out_bf, ref, atol=5e-2, rtol=5e-2), "bf16 fused mismatch"

    # 3) Streamed row-tiled fallback (large-N path), bf16.
    out_st = jax.block_until_ready(
        gresblock(x, adj, w1, b1, w2, b2, force_streaming=True))
    assert out_st.shape == (N, D)
    assert jnp.allclose(out_st, ref, atol=5e-2, rtol=5e-2), "streamed mismatch"

    print("KERNEL_OK")
</pallas_src>

<mosaic_0001>
module attributes {stable_mosaic.version = 11 : i64} {
  func.func @_fused_gresblock_kernel(%arg0: i32, %arg1: memref<16x16xf32, #tpu.memory_space<vmem>>, %arg2: memref<16x32xf32, #tpu.memory_space<vmem>>, %arg3: memref<1x32xf32, #tpu.memory_space<vmem>>, %arg4: memref<32x32xf32, #tpu.memory_space<vmem>>, %arg5: memref<1x32xf32, #tpu.memory_space<vmem>>, %arg6: memref<16x32xf32, #tpu.memory_space<vmem>>, %arg7: memref<16x32xf32, #tpu.memory_space<vmem>>) attributes {dimension_semantics = [#tpu.dimension_semantics<arbitrary>], iteration_bounds = array<i64: 1>, scalar_prefetch = 0 : i64, scratch_operands = 0 : i64, tpu.core_type = #tpu.core_type<tc>, window_params = [{pipeline_mode = #tpu.pipeline_mode<synchronous>, transform_indices = @transform_0, window_bounds = array<i64: 16, 16>}, {pipeline_mode = #tpu.pipeline_mode<synchronous>, transform_indices = @transform_1, window_bounds = array<i64: 16, 32>}, {pipeline_mode = #tpu.pipeline_mode<synchronous>, transform_indices = @transform_2, window_bounds = array<i64: 1, 32>}, {pipeline_mode = #tpu.pipeline_mode<synchronous>, transform_indices = @transform_3, window_bounds = array<i64: 32, 32>}, {pipeline_mode = #tpu.pipeline_mode<synchronous>, transform_indices = @transform_4, window_bounds = array<i64: 1, 32>}, {pipeline_mode = #tpu.pipeline_mode<synchronous>, transform_indices = @transform_5, window_bounds = array<i64: 16, 32>}, {pipeline_mode = #tpu.pipeline_mode<synchronous>, transform_indices = @transform_6, window_bounds = array<i64: 16, 32>}]} {
    %c0 = arith.constant 0 : index
    %c0_0 = arith.constant 0 : index
    %0 = vector.load %arg1[%c0, %c0_0] : memref<16x16xf32, #tpu.memory_space<vmem>>, vector<16x16xf32>
    %c0_1 = arith.constant 0 : index
    %c0_2 = arith.constant 0 : index
    %1 = vector.load %arg2[%c0_1, %c0_2] : memref<16x32xf32, #tpu.memory_space<vmem>>, vector<16x32xf32>
    %cst = arith.constant dense<0.000000e+00> : vector<16x32xf32>
    %2 = tpu.matmul %0, %1, %cst {dimension_numbers = #tpu.dot_dimension_numbers<[1], [0], [0], [1], [0, 0, 1, 1], [], []>} : vector<16x16xf32>, vector<16x32xf32>, vector<16x32xf32> -> vector<16x32xf32>
    %c0_3 = arith.constant 0 : index
    %c0_4 = arith.constant 0 : index
    %3 = vector.load %arg3[%c0_3, %c0_4] : memref<1x32xf32, #tpu.memory_space<vmem>>, vector<1x32xf32>
    %4 = vector.broadcast %3 : vector<1x32xf32> to vector<16x32xf32>
    %5 = arith.addf %2, %4 : vector<16x32xf32>
    %c0_5 = arith.constant 0 : index
    %c0_6 = arith.constant 0 : index
    %6 = vector.load %arg4[%c0_5, %c0_6] : memref<32x32xf32, #tpu.memory_space<vmem>>, vector<32x32xf32>
    %cst_7 = arith.constant dense<0.000000e+00> : vector<16x32xf32>
    %7 = tpu.matmul %5, %6, %cst_7 {dimension_numbers = #tpu.dot_dimension_numbers<[1], [0], [0], [1], [0, 0, 1, 1], [], []>} : vector<16x32xf32>, vector<32x32xf32>, vector<16x32xf32> -> vector<16x32xf32>
    %cst_8 = arith.constant dense<0.000000e+00> : vector<16x32xf32>
    %8 = tpu.matmul %0, %7, %cst_8 {dimension_numbers = #tpu.dot_dimension_numbers<[1], [0], [0], [1], [0, 0, 1, 1], [], []>} : vector<16x16xf32>, vector<16x32xf32>, vector<16x32xf32> -> vector<16x32xf32>
    %c0_9 = arith.constant 0 : index
    %c0_10 = arith.constant 0 : index
    %9 = vector.load %arg5[%c0_9, %c0_10] : memref<1x32xf32, #tpu.memory_space<vmem>>, vector<1x32xf32>
    %10 = vector.broadcast %9 : vector<1x32xf32> to vector<16x32xf32>
    %11 = arith.addf %8, %10 : vector<16x32xf32>
    %c0_11 = arith.constant 0 : index
    %c0_12 = arith.constant 0 : index
    %12 = vector.load %arg6[%c0_11, %c0_12] : memref<16x32xf32, #tpu.memory_space<vmem>>, vector<16x32xf32>
    %13 = arith.addf %12, %11 : vector<16x32xf32>
    %cst_13 = arith.constant 5.000000e-01 : f32
    %14 = vector.broadcast %cst_13 : f32 to vector<16x32xf32>
    %15 = arith.mulf %13, %14 : vector<16x32xf32>
    %c0_14 = arith.constant 0 : index
    %c0_15 = arith.constant 0 : index
    %16 = vector.load %arg7[%c0_14, %c0_15] : memref<16x32xf32, #tpu.memory_space<vmem>>, vector<16x32xf32>
    tpu.vector_store %arg7[%c0_14, %c0_15], %15 {strides = array<i32>} : memref<16x32xf32, #tpu.memory_space<vmem>>, vector<16x32xf32>,
    return
  }
  func.func @transform_0(%arg0: i32) -> (i32, i32) {
    %c0_i32 = arith.constant 0 : i32
    %c0_i32_0 = arith.constant 0 : i32
    %c0_i32_1 = arith.constant 0 : i32
    return %c0_i32, %c0_i32_0 : i32, i32
  }
  func.func @transform_1(%arg0: i32) -> (i32, i32) {
    %c0_i32 = arith.constant 0 : i32
    %c0_i32_0 = arith.constant 0 : i32
    %c0_i32_1 = arith.constant 0 : i32
    return %c0_i32, %c0_i32_0 : i32, i32
  }
  func.func @transform_2(%arg0: i32) -> (i32, i32) {
    %c0_i32 = arith.constant 0 : i32
    %c0_i32_0 = arith.constant 0 : i32
    %c0_i32_1 = arith.constant 0 : i32
    return %c0_i32, %c0_i32_0 : i32, i32
  }
  func.func @transform_3(%arg0: i32) -> (i32, i32) {
    %c0_i32 = arith.constant 0 : i32
    %c0_i32_0 = arith.constant 0 : i32
    %c0_i32_1 = arith.constant 0 : i32
    return %c0_i32, %c0_i32_0 : i32, i32
  }
  func.func @transform_4(%arg0: i32) -> (i32, i32) {
    %c0_i32 = arith.constant 0 : i32
    %c0_i32_0 = arith.constant 0 : i32
    %c0_i32_1 = arith.constant 0 : i32
    return %c0_i32, %c0_i32_0 : i32, i32
  }
  func.func @transform_5(%arg0: i32) -> (i32, i32) {
    %c0_i32 = arith.constant 0 : i32
    %c0_i32_0 = arith.constant 0 : i32
    %c0_i32_1 = arith.constant 0 : i32
    return %c0_i32, %c0_i32_0 : i32, i32
  }
  func.func @transform_6(%arg0: i32) -> (i32, i32) {
    %c0_i32 = arith.constant 0 : i32
    %c0_i32_0 = arith.constant 0 : i32
    %c0_i32_1 = arith.constant 0 : i32
    return %c0_i32, %c0_i32_0 : i32, i32
  }
}

</mosaic_0001>

<bundles_post_ra>
// kernel: gresblock.1
= control target key start
LH: loop header
LB: loop body
LE: loop exit
PB: predicated region body
PF: predicated region fallthrough
CT: control target
= control target key end

     0   :  { %vm35_vm0 = vcmask 130048   ;;  %s493_s0 = inlined_call_operand.vmem [shape: f32[16,16], index: 0, kind: input, shape index: {}]   ;;  %s494_s1 = inlined_call_operand.vmem [shape: f32[16,32], index: 1, kind: input, shape index: {}]   ;;  %s495_s2 = inlined_call_operand.vmem [shape: f32[1,32], index: 2, kind: input, shape index: {}]   ;;  %s496_s3 = inlined_call_operand.vmem [shape: f32[32,32], index: 3, kind: input, shape index: {}]   ;;  %s497_s4 = inlined_call_operand.vmem [shape: f32[1,32], index: 4, kind: input, shape index: {}]   ;;  %s498_s5 = inlined_call_operand.vmem [shape: f32[16,32], index: 5, kind: input, shape index: {}]   ;;  %s499_s6 = inlined_call_operand.hbm [shape: f32[16,32], index: 6, kind: output, shape index: {}]  }
   0x1   :  { %v26_v0 = vld [vmem:[%s494_s1] sm:$0xff]  ;;  %v27_v1 = vld [vmem:[%s494_s1 + $0x8] sm:$0xff] }
   0x2   :  { %v24_v2 = vld [vmem:[%s493_s0] sm:$0xff]  ;;  %v356_v3 = vpack.c.bf16 %v27_v1, %v26_v0  ;;  %v118_v5 = vld [vmem:[%s496_s3 + $0x8] sm:$0xff] }
   0x3   :  { %335 = vmatprep.mubr.msk.f32.mxu0 %vm35_vm0, %v24_v2  ;;  %v117_v4 = vld [vmem:[%s496_s3] sm:$0xff] }
   0x4   :  { %v360_v6 = vpack.c.bf16 %v118_v5, %v117_v4 }
   0x5   :  { %11 = vsyncpa [#allocation3], 0  ;;  %357 = vmatprep.subr.bf16.mxu0 %v356_v3  ;;  %v25_v7 = vld [vmem:[%s493_s0 + $0x8] sm:$0xff]  ;;  %v119_v8 = vld [vmem:[%s496_s3 + $0x10] sm:$0xff]  ;;  %vm121_vm1 = vcmask 261120   ;;  %s399_s17 = smov [#allocation2]  }
   0x6   :  { %359 = vmatpush3.bf16.msra.mxu0 %v356_v3  ;;  %361 = vmatprep.subr.bf16.mxu1 %v360_v6  ;;  %v120_v9 = vld [vmem:[%s496_s3 + $0x18] sm:$0xff]  ;;  %v309_v11 = vld [vmem:[%s495_s2] ss:$0 sm:$0xff]  ;;  %v286_v21 = vld [vmem:[%s498_s5 + $0x8] sm:$0xff]  ;;  %s298_s18 = sshll.u32 %s399_s17, 4  ;;  %s299_s18 = int_to_ptr.vmem [resolvable:$true] %s298_s18 }
   0x7   :  { %363 = vmatpush3.bf16.msra.mxu1 %v360_v6  ;;  %v364_v10 = vpack.c.bf16 %v120_v9, %v119_v8  ;;  %v314_v19 = vld [vmem:[%s497_s4] ss:$0 sm:$0xff]  ;;  %s375_s4 = scalar_lea.vmem %s299_s18, 256  ;;  %p380_p1 = scmp.lt.s32.totalorder %s299_s18, %s299_s18 }
   0x8   :  { %v285_v24 = vld [vmem:[%s498_s5] sm:$0xff]  ;;  %p376_p0 = scmp.ne.s32.totalorder %s299_s18, %s375_s4  ;;  %p381_p2 = scmp.lt.s32.totalorder %s375_s4, %s375_s4 }
   0x9   :  { %336 = vmatmul.mubr.msk.f32.vlgmr.msra.gmra.mrb[0].mxu0 %vm35_vm0, %v25_v7  ;;  %365 = vmatprep.subr.bf16.mxu1 %v364_v10 }
   0xa   :  { %353 = vmatprep.mubr.msk.f32.mxu0 %vm35_vm0, %v24_v2  ;;  %p382_p3 = por %p381_p2, %p380_p1 }
   0xb   :  { %367 = vmatpush3.bf16.msra.mxu1 %v364_v10 }
   0xc   :  { %p383_p4 = pnand %p382_p3, %p376_p0 }
  0xdc   :  { %v337_v12 = vpop.f32.mrb[0].mxu0 }
  0xdd   :  { %v108_v13 = vpop.f32.mrb[1].mxu0  ;;  %v114_v15 = vadd.f32 %v337_v12, %v309_v11 }
  0xde   :  { %v109_v14 = vadd.f32 %v309_v11, %v108_v13 }
  0xe0   :  { %346 = vmatprep.mubr.msk.f32.mxu1 %vm121_vm1, %v109_v14 }
  0xe1   :  { %347 = vmatmul.mubr.msk.f32.vlgmr.msra.gmra.mrb[0].mxu1 %vm121_vm1, %v114_v15 }
 0x1b4   :  { %v348_v16 = vpop.f32.mrb[0].mxu1 }
 0x1b5   :  { %v194_v17 = vpop.f32.mrb[1].mxu1 }
 0x1b6   :  { %v368_v18 = vpack.c.bf16 %v348_v16, %v194_v17 }
 0x1b8   :  { %369 = vmatprep.subr.bf16.mxu0 %v368_v18 }
 0x1b9   :  { %371 = vmatpush3.bf16.msra.mxu0 %v368_v18 }
 0x1bc   :  { %354 = vmatmul.mubr.msk.f32.vlgmr.msra.gmra.mrb[2].mxu0 %vm35_vm0, %v25_v7 }
 0x28f   :  { %v355_v20 = vpop.f32.mrb[2].mxu0 }
 0x290   :  { %v282_v22 = vadd.f32 %v355_v20, %v314_v19  ;;  %v276_v23 = vpop.f32.mrb[3].mxu0 }
 0x291   :  { %v277_v25 = vadd.f32 %v314_v19, %v276_v23 }
 0x292   :  { %v288_v26 = vadd.f32 %v286_v21, %v282_v22 }
 0x293   :  { %v287_v27 = vadd.f32 %v285_v24, %v277_v25 }
 0x294   :  { %v290_v28 = vmul.f32 0.5, %v288_v26 }
 0x295   :  { %v289_v29 = vmul.f32 0.5, %v287_v27 }
 0x296   :  { %292 = vst.msk [vmem:[#allocation2 + $0x8] sm:$0xff] %vm121_vm1, %v290_v28 }
 0x297   :  { %291 = vst.msk [vmem:[#allocation2] sm:$0xff] %vm121_vm1, %v289_v29 }
 0x298   :  { %386 = shalt.err (!%p383_p4)
}
 0x299   :  { %s387_s20 = scalar_lea.hbm %s499_s6, 256 }
 0x29a   :  { %p388_p5 = scmp.ne.s32.totalorder %s499_s6, %s387_s20  ;;  %p391_p6 = scmp.lt.u32.totalorder %s387_s20, %s499_s6 }
 0x29c   :  { %p393_p7 = pnand %p391_p6, %p388_p5 }
 0x29e   :  { %396 = shalt.err (!%p393_p7)
}
 0x29f   :  { %s400_s25 = smov 128   ;;  %s401_s26 = smov 8  }
 0x2a0   :  { %304 = dma.vmem_to_hbm [thread:$0]  %s299_s18, 256, %s499_s6, [#allocation3], %s400_s25, %s400_s25, %s401_s26  }
 0x2a1   :  { %397 = dma.done.wait [#allocation3], 256  }
 0x2a2   :  { %398 = vsyncadd [#allocation3], 4294967040 }
 0x2a3   :  { %308 = vsyncpa [#allocation3], 1 }

</bundles_post_ra>
